<compile_context>
chip_gen: v5e
topology: v5e:2x2
jax: 0.10.0
libtpu: 0.0.40
codegen_flags: <defaults>
</compile_context>

<pallas_src>
import functools

import jax
import jax.numpy as jnp
from jax.experimental import pallas as pl
from jax.experimental.pallas import tpu as pltpu


def _round_up(n: int, m: int) -> int:
    return ((n + m - 1) // m) * m


def net_kernel(x_ref, p_ref, out_ref, xpad_ref):
    """Fused MLP forward for one batch block.

    x_ref:    (bm, S)               raw state block (S = state_dim, unpadded)
    p_ref:    (s_pad + h_pad + 8, h_pad) packed param slab:
                rows [0        : s_pad)        -> w1ᵀ  (valid [:S, :48])
                rows [s_pad    : s_pad+h_pad)  -> w2ᵀ  (valid [:48, :A])
                row   s_pad+h_pad              -> b1   (valid [:48])
                row   s_pad+h_pad+1            -> b2   (valid [:A])
    out_ref:  (bm, h_pad)           lane-dense q output (valid [:, :A])
    xpad_ref: (bm, s_pad)           VMEM scratch, padded state in param dtype
    """
    S = x_ref.shape[1]
    s_pad = xpad_ref.shape[1]
    h_pad = p_ref.shape[1]

    # Zero-pad the state inside VMEM (no HBM round trip in the wrapper).
    xpad_ref[...] = jnp.zeros_like(xpad_ref)
    xpad_ref[:, 0:S] = x_ref[...].astype(xpad_ref.dtype)

    w1t = p_ref[0:s_pad, :]                       # (s_pad, h_pad)
    w2t = p_ref[s_pad:s_pad + h_pad, :]           # (h_pad, h_pad)
    tail = p_ref[s_pad + h_pad:, :].astype(jnp.float32)   # (8, h_pad)
    b1 = tail[0:1, :]                             # (1, h_pad)
    b2 = tail[1:2, :]                             # (1, h_pad)

    x = xpad_ref[...]                             # (bm, s_pad), param dtype

    # Hidden layer: padded x columns hit zero w1ᵀ rows -> exact.
    h = jnp.dot(x, w1t, preferred_element_type=jnp.float32) + b1
    h = jnp.maximum(h, 0.0)                       # relu, f32 epilogue (v5e-safe)

    # Output layer: padded hidden lanes hit zero w2ᵀ rows -> exact.
    q = jnp.dot(h.astype(w2t.dtype), w2t, preferred_element_type=jnp.float32) + b2

    # Lane-dense store of the full 128-wide tile (unmasked vst).
    out_ref[...] = q.astype(out_ref.dtype)


def pack_net_params(w1, b1, w2, b2, *, param_dtype=jnp.float32):
    """Pack PyTorch-layout params into one lane-128 slab.

    Call once per weight update (NOT per forward call).
    w1: (48, state_dim), b1: (48,), w2: (action_dim, 48), b2: (action_dim,)
    """
    hidden, state_dim = w1.shape
    action_dim = w2.shape[0]
    s_pad = _round_up(max(state_dim, 8), 8)
    h_pad = _round_up(max(hidden, action_dim, 128), 128)

    rows = s_pad + h_pad + 8                      # last 8-row tile = bias rows
    p = jnp.zeros((rows, h_pad), param_dtype)
    p = p.at[:state_dim, :hidden].set(w1.T.astype(param_dtype))
    p = p.at[s_pad:s_pad + hidden, :action_dim].set(w2.T.astype(param_dtype))
    p = p.at[s_pad + h_pad, :hidden].set(b1.astype(param_dtype))
    p = p.at[s_pad + h_pad + 1, :action_dim].set(b2.astype(param_dtype))
    return p


def net_forward(state, param_slab, *, action_dim, batch_block=256):
    """Forward pass of Net.

    state:      (B, state_dim) float
    param_slab: packed slab from pack_net_params (f32 or bf16)
    returns     (B, action_dim) f32
    """
    B, S = state.shape
    rows, h_pad = param_slab.shape
    s_pad = rows - h_pad - 8
    assert S <= s_pad, "state_dim larger than packed slab supports"
    param_dtype = param_slab.dtype

    # Tile the batch only when it is big enough to matter (training batches);
    # tiny inference batches stay single-block (pure VMEM, no pipeline).
    tiled = (B > batch_block) and (B % batch_block == 0)
    bm = batch_block if tiled else B
    grid = (B // bm,)

    cost = pl.CostEstimate(
        flops=2 * B * (s_pad * h_pad + h_pad * h_pad),
        transcendentals=0,
        bytes_accessed=(state.size * state.dtype.itemsize
                        + param_slab.size * param_slab.dtype.itemsize
                        + B * h_pad * 4),
    )

    q_full = pl.pallas_call(
        net_kernel,
        out_shape=jax.ShapeDtypeStruct((B, h_pad), jnp.float32),
        grid=grid,
        in_specs=[
            pl.BlockSpec((bm, S), lambda i: (i, 0)),          # state block
            pl.BlockSpec((rows, h_pad), lambda i: (0, 0)),    # whole slab
        ],
        out_specs=pl.BlockSpec((bm, h_pad), lambda i: (i, 0)),
        scratch_shapes=[pltpu.VMEM((bm, s_pad), param_dtype)],
        compiler_params=pltpu.CompilerParams(
            dimension_semantics=("parallel",)),               # v7x: both TCs
        cost_estimate=cost,
    )(state, param_slab)

    # Cheap slice under the caller's jit; the kernel store stays lane-dense.
    # TODO(synk): for a full DQN act() path, fuse argmax over q into the
    # kernel epilogue and return int32 actions instead of slicing here.
    return q_full[:, :action_dim]


if __name__ == "__main__":
    # Small DQN-like shapes: state_dim=4 (CartPole), action_dim=2, batch=8.
    batch, state_dim, hidden, action_dim = 8, 4, 48, 2

    key = jax.random.PRNGKey(0)
    k_x, k_w1, k_b1, k_w2, k_b2 = jax.random.split(key, 5)

    # Deterministic init mirroring .normal_(0, 0.1) in the PyTorch __init__.
    x = jax.random.normal(k_x, (batch, state_dim), dtype=jnp.float32)
    w1 = 0.1 * jax.random.normal(k_w1, (hidden, state_dim), dtype=jnp.float32)
    b1 = 0.1 * jax.random.normal(k_b1, (hidden,), dtype=jnp.float32)
    w2 = 0.1 * jax.random.normal(k_w2, (action_dim, hidden), dtype=jnp.float32)
    b2 = 0.1 * jax.random.normal(k_b2, (action_dim,), dtype=jnp.float32)

    # Pack ONCE (per weight update in a real DQN loop), outside the step jit.
    slab_f32 = pack_net_params(w1, b1, w2, b2, param_dtype=jnp.float32)

    fwd = jax.jit(net_forward, static_argnames=("action_dim", "batch_block"))

    # f32 path: exact.
    q = fwd(x, slab_f32, action_dim=action_dim)
    jax.block_until_ready(q)

    h_ref = jnp.maximum(x @ w1.T + b1, 0.0)
    q_ref = h_ref @ w2.T + b2
    assert q.shape == (batch, action_dim)
    assert jnp.allclose(q, q_ref, atol=1e-5, rtol=1e-5)

    # bf16-weight path (v6e/v7x DMA/MXU win), f32 accumulation + epilogue.
    slab_bf16 = pack_net_params(w1, b1, w2, b2, param_dtype=jnp.bfloat16)
    q_bf16 = fwd(x, slab_bf16, action_dim=action_dim)
    jax.block_until_ready(q_bf16)
    assert jnp.allclose(q_bf16, q_ref, atol=3e-2, rtol=3e-2)

    print("KERNEL_OK")
</pallas_src>

<mosaic_0001>
module attributes {stable_mosaic.version = 11 : i64} {
  func.func @net_kernel(%arg0: i32, %arg1: memref<8x4xf32, #tpu.memory_space<vmem>>, %arg2: memref<144x128xf32, #tpu.memory_space<vmem>>, %arg3: memref<8x128xf32, #tpu.memory_space<vmem>>, %arg4: memref<8x8xf32, #tpu.memory_space<vmem>>) attributes {dimension_semantics = [#tpu.dimension_semantics<parallel>], iteration_bounds = array<i64: 1>, scalar_prefetch = 0 : i64, scratch_operands = 1 : i64, tpu.core_type = #tpu.core_type<tc>, window_params = [{transform_indices = @transform_0, window_bounds = array<i64: 8, 4>}, {pipeline_mode = #tpu.pipeline_mode<synchronous>, transform_indices = @transform_1, window_bounds = array<i64: 144, 128>}, {transform_indices = @transform_2, window_bounds = array<i64: 8, 128>}]} {
    %cst = arith.constant 0.000000e+00 : f32
    %0 = vector.broadcast %cst : f32 to vector<8x8xf32>
    %c0 = arith.constant 0 : index
    %c0_0 = arith.constant 0 : index
    %1 = vector.load %arg4[%c0, %c0_0] : memref<8x8xf32, #tpu.memory_space<vmem>>, vector<8x8xf32>
    tpu.vector_store %arg4[%c0, %c0_0], %0 {strides = array<i32>} : memref<8x8xf32, #tpu.memory_space<vmem>>, vector<8x8xf32>,
    %c0_1 = arith.constant 0 : index
    %c0_2 = arith.constant 0 : index
    %2 = vector.load %arg1[%c0_1, %c0_2] : memref<8x4xf32, #tpu.memory_space<vmem>>, vector<8x4xf32>
    %c0_3 = arith.constant 0 : index
    %c0_4 = arith.constant 0 : index
    %3 = vector.load %arg4[%c0_3, %c0_4] : memref<8x8xf32, #tpu.memory_space<vmem>>, vector<8x4xf32>
    tpu.vector_store %arg4[%c0_3, %c0_4], %2 {strides = array<i32>} : memref<8x8xf32, #tpu.memory_space<vmem>>, vector<8x4xf32>,
    %c0_5 = arith.constant 0 : index
    %c0_6 = arith.constant 0 : index
    %4 = vector.load %arg2[%c0_5, %c0_6] : memref<144x128xf32, #tpu.memory_space<vmem>>, vector<8x128xf32>
    %c8 = arith.constant 8 : index
    %c0_7 = arith.constant 0 : index
    %5 = vector.load %arg2[%c8, %c0_7] : memref<144x128xf32, #tpu.memory_space<vmem>>, vector<128x128xf32>
    %c136 = arith.constant 136 : index
    %c0_8 = arith.constant 0 : index
    %6 = vector.load %arg2[%c136, %c0_8] : memref<144x128xf32, #tpu.memory_space<vmem>>, vector<8x128xf32>
    %7 = vector.extract_strided_slice %6 {offsets = [0, 0], sizes = [1, 128], strides = [1, 1]} : vector<8x128xf32> to vector<1x128xf32>
    %8 = vector.extract_strided_slice %6 {offsets = [1, 0], sizes = [1, 128], strides = [1, 1]} : vector<8x128xf32> to vector<1x128xf32>
    %c0_9 = arith.constant 0 : index
    %c0_10 = arith.constant 0 : index
    %9 = vector.load %arg4[%c0_9, %c0_10] : memref<8x8xf32, #tpu.memory_space<vmem>>, vector<8x8xf32>
    %cst_11 = arith.constant dense<0.000000e+00> : vector<8x128xf32>
    %10 = tpu.matmul %9, %4, %cst_11 {dimension_numbers = #tpu.dot_dimension_numbers<[1], [0], [0], [1], [0, 0, 1, 1], [], []>} : vector<8x8xf32>, vector<8x128xf32>, vector<8x128xf32> -> vector<8x128xf32>
    %11 = vector.broadcast %7 : vector<1x128xf32> to vector<8x128xf32>
    %12 = arith.addf %10, %11 : vector<8x128xf32>
    %cst_12 = arith.constant 0.000000e+00 : f32
    %13 = vector.broadcast %cst_12 : f32 to vector<8x128xf32>
    %14 = arith.maximumf %12, %13 : vector<8x128xf32>
    %cst_13 = arith.constant dense<0.000000e+00> : vector<8x128xf32>
    %15 = tpu.matmul %14, %5, %cst_13 {dimension_numbers = #tpu.dot_dimension_numbers<[1], [0], [0], [1], [0, 0, 1, 1], [], []>} : vector<8x128xf32>, vector<128x128xf32>, vector<8x128xf32> -> vector<8x128xf32>
    %16 = vector.broadcast %8 : vector<1x128xf32> to vector<8x128xf32>
    %17 = arith.addf %15, %16 : vector<8x128xf32>
    %c0_14 = arith.constant 0 : index
    %c0_15 = arith.constant 0 : index
    %18 = vector.load %arg3[%c0_14, %c0_15] : memref<8x128xf32, #tpu.memory_space<vmem>>, vector<8x128xf32>
    tpu.vector_store %arg3[%c0_14, %c0_15], %17 {strides = array<i32>} : memref<8x128xf32, #tpu.memory_space<vmem>>, vector<8x128xf32>,
    return
  }
  func.func @transform_0(%arg0: i32) -> (i32, i32) {
    %c0_i32 = arith.constant 0 : i32
    %c0_i32_0 = arith.constant 0 : i32
    return %arg0, %c0_i32 : i32, i32
  }
  func.func @transform_1(%arg0: i32) -> (i32, i32) {
    %c0_i32 = arith.constant 0 : i32
    %c0_i32_0 = arith.constant 0 : i32
    %c0_i32_1 = arith.constant 0 : i32
    return %c0_i32, %c0_i32_0 : i32, i32
  }
  func.func @transform_2(%arg0: i32) -> (i32, i32) {
    %c0_i32 = arith.constant 0 : i32
    %c0_i32_0 = arith.constant 0 : i32
    return %arg0, %c0_i32 : i32, i32
  }
}

</mosaic_0001>

<bundles_post_ra>
// kernel: net_forward.1
= control target key start
LH: loop header
LB: loop body
LE: loop exit
PB: predicated region body
PF: predicated region fallthrough
CT: control target
= control target key end

     0   :  { %7 = vsyncpa [#allocation4], 0  ;;  %s134_s12 = smov [#allocation3]   ;;  %s135_s14 = smov 128   ;;  %s164_s0 = inlined_call_operand.vmem [shape: f32[8,4], index: 0, kind: input, shape index: {}]   ;;  %s165_s1 = inlined_call_operand.hbm [shape: f32[144,128], index: 1, kind: input, shape index: {}]   ;;  %s166_s2 = inlined_call_operand.vmem [shape: f32[8,128], index: 2, kind: output, shape index: {}]  }
   0x1   :  { %s14_s11 = sshll.u32 %s165_s1, 4  ;;  %s16_s13 = sshll.u32 %s134_s12, 4  ;;  %s15_s11 = int_to_ptr.hbm [resolvable:$true] %s14_s11  ;;  %s17_s13 = int_to_ptr.vmem [resolvable:$true] %s16_s13 }
   0x2   :  { %s136_s15 = smov 8  }
   0x3   :  { %22 = dma.hbm_to_vmem [thread:$0]  %s15_s11, 2304, %s17_s13, [#allocation4], %s135_s14, %s135_s14, %s136_s15  }
   0x4   :  { %132 = dma.done.wait [#allocation4], 2304  }
   0x5   :  { %133 = vsyncadd [#allocation4], 4294964992  ;;  %vm27_vm0 = vcmask 64512   ;;  %v137_v0 = vmov 0.0   ;;  %vm30_vm1 = vcmask 31744   ;;  %v32_v1 = vld [vmem:[#allocation3] sm:$0xff] }
   0x6   :  { %28 = vst.msk [vmem:[#allocation2] sm:$0xff] %vm27_vm0, %v137_v0  ;;  %v29_v2 = vld [vmem:[%s164_s0] sm:$0xff]  ;;  %v48_v3 = vld [vmem:[#allocation3 + $0x80] sm:$0xff]  ;;  %70 = vmatpush.msra.mxu0 %v32_v1  ;;  %v46_v5 = vld [vmem:[#allocation3 + $0x70] sm:$0xff] }
   0x7   :  { %31 = vst.msk [vmem:[#allocation2] sm:$0xff] %vm30_vm1, %v29_v2  ;;  %77 = vmatpush.msra.mxu1 %v48_v3  ;;  %v47_v4 = vld [vmem:[#allocation3 + $0x78] sm:$0xff]  ;;  %v45_v6 = vld [vmem:[#allocation3 + $0x68] sm:$0xff]  ;;  %v44_v7 = vld [vmem:[#allocation3 + $0x60] sm:$0xff] }
   0x8   :  { %v43_v9 = vld [vmem:[#allocation3 + $0x58] sm:$0xff]  ;;  %v42_v10 = vld [vmem:[#allocation3 + $0x50] sm:$0xff]  ;;  %v41_v11 = vld [vmem:[#allocation3 + $0x48] sm:$0xff] }
   0x9   :  { %78 = vmatpush.msra.mxu1 %v47_v4  ;;  %v40_v12 = vld [vmem:[#allocation3 + $0x40] sm:$0xff]  ;;  %v39_v13 = vld [vmem:[#allocation3 + $0x38] sm:$0xff]  ;;  %v38_v14 = vld [vmem:[#allocation3 + $0x30] sm:$0xff] }
   0xa   :  { %v37_v15 = vld [vmem:[#allocation3 + $0x28] sm:$0xff]  ;;  %v36_v16 = vld [vmem:[#allocation3 + $0x20] sm:$0xff]  ;;  %v35_v17 = vld [vmem:[#allocation3 + $0x18] sm:$0xff] }
   0xb   :  { %79 = vmatpush.msra.mxu1 %v46_v5  ;;  %v34_v18 = vld [vmem:[#allocation3 + $0x10] sm:$0xff]  ;;  %v33_v19 = vld [vmem:[#allocation3 + $0x8] sm:$0xff] }
   0xc   :  { %v49_v20 = vld [vmem:[#allocation3 + $0x88] sm:$0xff] }
   0xd   :  { %80 = vmatpush.msra.mxu1 %v45_v6  ;;  %v51_v21 = vperm.slane %v49_v20, 0  ;;  %v76_v25 = vperm.slane %v49_v20, 1 }
   0xe   :  { %v50_v8 = vld [vmem:[#allocation2] sm:$0xff] }
   0xf   :  { %103 = vmatmul.msk.f32.vlgmr.msra.gmra.mxu0 %vm27_vm0, %v50_v8  ;;  %81 = vmatpush.msra.mxu1 %v44_v7 }
  0x11   :  { %82 = vmatpush.msra.mxu1 %v43_v9 }
  0x13   :  { %83 = vmatpush.msra.mxu1 %v42_v10 }
  0x15   :  { %84 = vmatpush.msra.mxu1 %v41_v11 }
  0x17   :  { %85 = vmatpush.msra.mxu1 %v40_v12 }
  0x19   :  { %86 = vmatpush.msra.mxu1 %v39_v13 }
  0x1b   :  { %87 = vmatpush.msra.mxu1 %v38_v14 }
  0x1d   :  { %88 = vmatpush.msra.mxu1 %v37_v15 }
  0x1f   :  { %89 = vmatpush.msra.mxu1 %v36_v16 }
  0x21   :  { %90 = vmatpush.msra.mxu1 %v35_v17 }
  0x23   :  { %91 = vmatpush.msra.mxu1 %v34_v18 }
  0x25   :  { %92 = vmatpush.msra.mxu1 %v33_v19 }
  0x8c   :  { %v72_v22 = vpop.f32.mrf.mxu0 }
  0x8d   :  { %v73_v23 = vadd.f32 %v72_v22, %v51_v21 }
  0x8f   :  { %v75_v24 = vmax.f32 %v73_v23, 0.0 }
  0x91   :  { %93 = vmatmul.f32.vlgmr.msra.gmra.mxu1 %v75_v24 }
 0x10e   :  { %v94_v26 = vpop.f32.mrf.mxu1 }
 0x10f   :  { %v95_v27 = vadd.f32 %v94_v26, %v76_v25 }
 0x111   :  { %97 = vst [vmem:[%s166_s2] sm:$0xff] %v95_v27 }
 0x112   :  { %102 = vsyncpa [#allocation4], 1 }

</bundles_post_ra>
